<compile_context>
chip_gen: v7x
topology: tpu7x:2x2x1
jax: 0.10.0
libtpu: 0.0.40
codegen_flags: <defaults>
</compile_context>

<pallas_src>
import math

import jax
import jax.numpy as jnp
from jax.experimental import pallas as pl
from jax.experimental.pallas import tpu as pltpu


_TARGET_STREAM_BYTES = 2 * 1024 * 1024   # ~2 MiB per activation-stream block
_MIN_SPLIT_BLOCK = 1 * 1024 * 1024       # don't shrink a stream block below ~1 MiB
_MIN_GRID_STEPS = 4                      # enough steps to feed v7x's two TCs
_MAX_TB = 64                             # bound the in-kernel batch loop


def _vmem_capacity_bytes():
    try:
        cap = getattr(pltpu.get_tpu_info(), "vmem_capacity_bytes", None)
        if cap:
            return int(cap)
    except Exception:
        pass
    return 64 * 1024 * 1024   # conservative fallback: v7x per-TensorCore VMEM


def _choose_tiles(B, C, N, bneck_p, itemsize, n_act_streams):
    """Pick (tb, tn, vmem_limit_bytes).

    Generation-aware: budget scales with physical VMEM (64 MiB v7x, 128 MiB
    v5e/v6e).  The cost model counts the double-buffered activation streams
    *and* the in-kernel f32 intermediates (up, x_f32, down) per token column.
    """
    vmem_cap = _vmem_capacity_bytes()
    vmem_limit = vmem_cap // 2                    # 32 MiB v7x / 64 MiB v5e,v6e
    budget = (vmem_limit * 3) // 4                # headroom for scratch/spill

    # Bytes per (batch-row, token-column):
    #   act streams (x, out[, res]) double-buffered  +  f32 temps (up, x_f32)
    #   +  bottleneck activations (f32 accumulate + dtype cast).
    per_tok = (C * (n_act_streams * 2 * itemsize + 2 * 4)
               + bneck_p * (4 + itemsize))
    weight_bytes = 2 * (2 * bneck_p * C * itemsize) + 8 * (bneck_p + C)
    act_budget = max(budget - weight_bytes, 1 << 20)

    per_batch_act = C * N * itemsize              # one stream, one batch row

    if B > 1 and per_batch_act <= _TARGET_STREAM_BYTES:
        # Small feature map: block over batch to amortize per-step overhead.
        tn = N
        tb_cap = min(B, _MAX_TB,
                     max(1, act_budget // max(per_tok * N, 1)),
                     max(1, _TARGET_STREAM_BYTES // max(per_batch_act, 1)))
        # Largest divisor of B within the cap (avoids partial batch blocks).
        tb = max(d for d in range(1, tb_cap + 1) if B % d == 0)
    else:
        tb = 1
        tn_cap = min(N,
                     max(1, act_budget // per_tok),
                     max(128, _TARGET_STREAM_BYTES // max(C * itemsize, 1)))
        if tn_cap >= N:
            tn = N                                # full dim: always legal
        else:
            tn = max(128, (tn_cap // 128) * 128)  # lane-dense 128 multiple
        if tn > N:                                # tiny N under the 128 floor
            tn = N
        # NOTE: for extremely large C the 128-token floor can still exceed the
        # nominal budget; vmem_limit is raised toward physical VMEM below.

    # Ensure v7x megacore sees enough parallel grid steps, but only when the
    # resulting blocks stay big enough that splitting is not pure overhead.
    def n_steps(tb_, tn_):
        return pl.cdiv(B, tb_) * pl.cdiv(N, tn_)

    while n_steps(tb, tn) < _MIN_GRID_STEPS:
        stream_block = tb * C * tn * itemsize
        if stream_block < 2 * _MIN_SPLIT_BLOCK:
            break
        if tb > 1:
            half = max(1, (tb + 1) // 2)
            tb = max(d for d in range(1, half + 1) if B % d == 0)
        elif tn > 128 and tn % 256 == 0:
            tn //= 2
        elif tn == N and N > 256:
            tn = max(128, ((N // 2) // 128) * 128)
        else:
            break

    est = tb * tn * per_tok + weight_bytes
    vmem_limit = int(max(vmem_limit, min(vmem_cap, est + (4 << 20))))
    return int(tb), int(tn), vmem_limit


def _make_kernel(tb, separate_residual):
    """Kernel over an activation block of shape (tb, C, tn)."""

    def compute_one(x, r, wdT, bd, wuT, bu, out_dtype):
        # down-proj (BN folded into wdT/bd) + ReLU; dropout == identity (eval)
        down = jnp.dot(wdT, x, preferred_element_type=jnp.float32)
        down = jnp.maximum(down + bd, 0.0).astype(x.dtype)        # (Bp, tn)
        # up-proj (adapter scale folded into wuT/bu) + residual
        up = jnp.dot(wuT, down, preferred_element_type=jnp.float32) + bu
        return (up + r.astype(jnp.float32)).astype(out_dtype)     # (C, tn)

    if separate_residual:
        def kernel(x_ref, r_ref, wdT_ref, bd_ref, wuT_ref, bu_ref, o_ref):
            wdT = wdT_ref[...]
            bd = bd_ref[...]
            wuT = wuT_ref[...]
            bu = bu_ref[...]
            if tb <= 8:
                for b in range(tb):
                    o_ref[b] = compute_one(x_ref[b], r_ref[b], wdT, bd, wuT,
                                           bu, o_ref.dtype)
            else:
                @pl.loop(0, tb)
                def _(b):
                    o_ref[b] = compute_one(x_ref[b], r_ref[b], wdT, bd, wuT,
                                           bu, o_ref.dtype)
    else:
        def kernel(x_ref, wdT_ref, bd_ref, wuT_ref, bu_ref, o_ref):
            wdT = wdT_ref[...]
            bd = bd_ref[...]
            wuT = wuT_ref[...]
            bu = bu_ref[...]
            if tb <= 8:
                for b in range(tb):
                    x = x_ref[b]
                    o_ref[b] = compute_one(x, x, wdT, bd, wuT, bu, o_ref.dtype)
            else:
                @pl.loop(0, tb)
                def _(b):
                    x = x_ref[b]
                    o_ref[b] = compute_one(x, x, wdT, bd, wuT, bu, o_ref.dtype)
    return kernel


def adapter_forward(x_nchw, params, *, scale=1.0, residual_nchw=None):
    """x_nchw: (B, C, H, W). Returns (B, C, H, W). Eval-mode semantics."""
    B, C, H, W = x_nchw.shape
    N = H * W
    dtype = x_nchw.dtype
    itemsize = jnp.dtype(dtype).itemsize

    # Free reshapes only -- no transposes in this layout (lane axis = N=H*W).
    x = x_nchw.reshape(B, C, N)
    res = None if residual_nchw is None else residual_nchw.reshape(B, C, N)

    # Fold eval-mode BatchNorm2d ('in') into the down-proj and the adapter
    # scale into the up-proj (mathematically exact).
    eps = 1e-5
    bn_scale = params["bn_gamma"] / jnp.sqrt(params["bn_running_var"] + eps)  # (C,)
    bn_shift = params["bn_beta"] - params["bn_running_mean"] * bn_scale       # (C,)

    wd = params["w_down"]                 # (C, bneck)  == down_proj.weight.T
    bd = params["b_down"].reshape(-1)     # (bneck,)
    wu = params["w_up"]                   # (bneck, C)  == up_proj.weight.T
    bu = params["b_up"].reshape(-1)       # (C,)
    bneck = wd.shape[1]

    wd_eff = bn_scale[:, None] * wd                       # (C, bneck)
    bd_eff = bn_shift @ wd + bd                           # (bneck,)
    wu_eff = scale * wu                                   # (bneck, C)
    bu_eff = scale * bu                                   # (C,)

    # Zero-pad the bottleneck to the dtype's sublane packing (8 f32 / 16 bf16 /
    # 32 int8); padded rows/cols are exactly 0 so results are unchanged.
    pack = max(8, 32 // itemsize)
    bneck_p = max(pack, ((bneck + pack - 1) // pack) * pack)
    if bneck_p != bneck:
        pad = bneck_p - bneck
        wd_eff = jnp.pad(wd_eff, ((0, 0), (0, pad)))
        bd_eff = jnp.pad(bd_eff, (0, pad))
        wu_eff = jnp.pad(wu_eff, ((0, pad), (0, 0)))

    wdT = wd_eff.T.astype(dtype)                          # (bneck_p, C)
    wuT = wu_eff.T.astype(dtype)                          # (C, bneck_p)
    bd2 = bd_eff.astype(jnp.float32).reshape(bneck_p, 1)
    bu2 = bu_eff.astype(jnp.float32).reshape(C, 1)

    n_act_streams = 2 if res is None else 3               # (x, out) [+ residual]
    tb, tn, vmem_limit = _choose_tiles(B, C, N, bneck_p, itemsize, n_act_streams)
    grid = (pl.cdiv(B, tb), pl.cdiv(N, tn))

    act_spec = pl.BlockSpec((tb, C, tn), lambda b, t: (b, 0, t))
    wdT_spec = pl.BlockSpec((bneck_p, C), lambda b, t: (0, 0))
    bd_spec = pl.BlockSpec((bneck_p, 1), lambda b, t: (0, 0))
    wuT_spec = pl.BlockSpec((C, bneck_p), lambda b, t: (0, 0))
    bu_spec = pl.BlockSpec((C, 1), lambda b, t: (0, 0))

    compiler_params = pltpu.CompilerParams(
        dimension_semantics=("parallel", "parallel"),   # B-tile and N-tile
        vmem_limit_bytes=vmem_limit,
    )

    kernel = _make_kernel(tb, separate_residual=res is not None)

    if res is None:
        out = pl.pallas_call(
            kernel,
            out_shape=jax.ShapeDtypeStruct((B, C, N), dtype),
            grid_spec=pltpu.PrefetchScalarGridSpec(
                num_scalar_prefetch=0,
                grid=grid,
                in_specs=[act_spec, wdT_spec, bd_spec, wuT_spec, bu_spec],
                out_specs=act_spec,
            ),
            compiler_params=compiler_params,
        )(x, wdT, bd2, wuT, bu2)
    else:
        out = pl.pallas_call(
            kernel,
            out_shape=jax.ShapeDtypeStruct((B, C, N), dtype),
            grid_spec=pltpu.PrefetchScalarGridSpec(
                num_scalar_prefetch=0,
                grid=grid,
                in_specs=[act_spec, act_spec, wdT_spec, bd_spec, wuT_spec, bu_spec],
                out_specs=act_spec,
            ),
            compiler_params=compiler_params,
        )(x, res, wdT, bd2, wuT, bu2)

    return out.reshape(B, C, H, W)


def _reference_forward(x_nchw, params, *, scale=1.0, residual_nchw=None):
    """Pure-JAX reference mirroring the PyTorch forward (eval mode)."""
    if residual_nchw is None:
        residual_nchw = x_nchw
    B, C, H, W = x_nchw.shape
    eps = 1e-5
    bn_scale = params["bn_gamma"] / jnp.sqrt(params["bn_running_var"] + eps)
    bn_shift = params["bn_beta"] - params["bn_running_mean"] * bn_scale
    xbn = x_nchw * bn_scale[None, :, None, None] + bn_shift[None, :, None, None]
    x_tok = jnp.transpose(xbn.reshape(B, C, H * W), (0, 2, 1))          # (B,N,C)
    down = jnp.maximum(x_tok @ params["w_down"] + params["b_down"], 0.0)
    up = (down @ params["w_up"] + params["b_up"]) * scale
    up = jnp.transpose(up, (0, 2, 1)).reshape(B, C, H, W)
    return up + residual_nchw


def _make_params(key, d_model, bottleneck):
    kwd, kbd, kwu, kbu, kg, kb, km, kv = jax.random.split(key, 8)
    bound_d = 1.0 / math.sqrt(d_model)
    bound_u = 1.0 / math.sqrt(bottleneck)
    return {
        # stored pre-transposed for the wrapper: (in, out)
        "w_down": jax.random.uniform(kwd, (d_model, bottleneck),
                                     minval=-bound_d, maxval=bound_d,
                                     dtype=jnp.float32),
        "b_down": jax.random.uniform(kbd, (1, bottleneck),
                                     minval=-bound_d, maxval=bound_d,
                                     dtype=jnp.float32),
        "w_up": jax.random.uniform(kwu, (bottleneck, d_model),
                                   minval=-bound_u, maxval=bound_u,
                                   dtype=jnp.float32),
        "b_up": jax.random.uniform(kbu, (1, d_model),
                                   minval=-bound_u, maxval=bound_u,
                                   dtype=jnp.float32),
        # Non-trivial eval-mode BN state so the weight-fold path is exercised.
        "bn_gamma": 1.0 + 0.1 * jax.random.normal(kg, (d_model,), jnp.float32),
        "bn_beta": 0.1 * jax.random.normal(kb, (d_model,), jnp.float32),
        "bn_running_mean": 0.1 * jax.random.normal(km, (d_model,), jnp.float32),
        "bn_running_var": 1.0 + 0.1 * jax.random.uniform(kv, (d_model,),
                                                         dtype=jnp.float32),
    }


if __name__ == "__main__":
    key = jax.random.PRNGKey(0)
    k1, k2, k3, kp1, kp2 = jax.random.split(key, 5)

    # --- main test: module-consistent small shapes (d_model == channels) ----
    B, C, H, W = 2, 32, 16, 16
    d_model, bottleneck = C, 8
    scale = 1.0            # adapter_scalar='1.0'

    x = jax.random.normal(k1, (B, C, H, W), dtype=jnp.float32)
    res_sep = jax.random.normal(k2, (B, C, H, W), dtype=jnp.float32)
    params = _make_params(kp1, d_model, bottleneck)

    # Default path (residual == x, single input stream).
    out = jax.block_until_ready(adapter_forward(x, params, scale=scale))
    ref = _reference_forward(x, params, scale=scale)
    assert out.shape == (B, C, H, W)
    assert jnp.allclose(out, ref, atol=1e-4, rtol=1e-4), \
        float(jnp.max(jnp.abs(out - ref)))

    # Distinct-residual path (extra input stream).
    out2 = jax.block_until_ready(
        adapter_forward(x, params, scale=scale, residual_nchw=res_sep))
    ref2 = _reference_forward(x, params, scale=scale, residual_nchw=res_sep)
    assert jnp.allclose(out2, ref2, atol=1e-4, rtol=1e-4), \
        float(jnp.max(jnp.abs(out2 - ref2)))

    # --- extra test: non-128-aligned spatial size + odd batch (batch-blocked,
    #     full-N lane block) to exercise the new tiling paths --------------
    B3, C3, H3, W3 = 3, 32, 10, 10
    x3 = jax.random.normal(k3, (B3, C3, H3, W3), dtype=jnp.float32)
    params3 = _make_params(kp2, C3, bottleneck)
    out3 = jax.block_until_ready(adapter_forward(x3, params3, scale=0.5))
    ref3 = _reference_forward(x3, params3, scale=0.5)
    assert jnp.allclose(out3, ref3, atol=1e-4, rtol=1e-4), \
        float(jnp.max(jnp.abs(out3 - ref3)))

    print("KERNEL_OK")
</pallas_src>

<mosaic_0001>
module attributes {stable_mosaic.version = 11 : i64} {
  func.func @kernel(%arg0: i32, %arg1: i32, %arg2: memref<2x32x256xf32, #tpu.memory_space<vmem>>, %arg3: memref<8x32xf32, #tpu.memory_space<vmem>>, %arg4: memref<8x1xf32, #tpu.memory_space<vmem>>, %arg5: memref<32x8xf32, #tpu.memory_space<vmem>>, %arg6: memref<32x1xf32, #tpu.memory_space<vmem>>, %arg7: memref<2x32x256xf32, #tpu.memory_space<vmem>>) attributes {dimension_semantics = [#tpu.dimension_semantics<parallel>, #tpu.dimension_semantics<parallel>], iteration_bounds = array<i64: 1, 1>, scalar_prefetch = 0 : i64, scratch_operands = 0 : i64, tpu.core_type = #tpu.core_type<tc>, window_params = [{transform_indices = @transform_0, window_bounds = array<i64: 2, 32, 256>}, {pipeline_mode = #tpu.pipeline_mode<synchronous>, transform_indices = @transform_1, window_bounds = array<i64: 8, 32>}, {pipeline_mode = #tpu.pipeline_mode<synchronous>, transform_indices = @transform_2, window_bounds = array<i64: 8, 1>}, {pipeline_mode = #tpu.pipeline_mode<synchronous>, transform_indices = @transform_3, window_bounds = array<i64: 32, 8>}, {pipeline_mode = #tpu.pipeline_mode<synchronous>, transform_indices = @transform_4, window_bounds = array<i64: 32, 1>}, {transform_indices = @transform_5, window_bounds = array<i64: 2, 32, 256>}]} {
    %c0 = arith.constant 0 : index
    %c0_0 = arith.constant 0 : index
    %0 = vector.load %arg3[%c0, %c0_0] : memref<8x32xf32, #tpu.memory_space<vmem>>, vector<8x32xf32>
    %c0_1 = arith.constant 0 : index
    %c0_2 = arith.constant 0 : index
    %1 = vector.load %arg4[%c0_1, %c0_2] : memref<8x1xf32, #tpu.memory_space<vmem>>, vector<8x1xf32>
    %c0_3 = arith.constant 0 : index
    %c0_4 = arith.constant 0 : index
    %2 = vector.load %arg5[%c0_3, %c0_4] : memref<32x8xf32, #tpu.memory_space<vmem>>, vector<32x8xf32>
    %c0_5 = arith.constant 0 : index
    %c0_6 = arith.constant 0 : index
    %3 = vector.load %arg6[%c0_5, %c0_6] : memref<32x1xf32, #tpu.memory_space<vmem>>, vector<32x1xf32>
    %c0_7 = arith.constant 0 : index
    %c0_8 = arith.constant 0 : index
    %c0_9 = arith.constant 0 : index
    %4 = vector.load %arg2[%c0_7, %c0_8, %c0_9] : memref<2x32x256xf32, #tpu.memory_space<vmem>>, vector<1x32x256xf32>
    %5 = vector.shape_cast %4 : vector<1x32x256xf32> to vector<32x256xf32>
    %cst = arith.constant dense<0.000000e+00> : vector<8x256xf32>
    %6 = tpu.matmul %0, %5, %cst {dimension_numbers = #tpu.dot_dimension_numbers<[1], [0], [0], [1], [0, 0, 1, 1], [], []>} : vector<8x32xf32>, vector<32x256xf32>, vector<8x256xf32> -> vector<8x256xf32>
    %7 = vector.broadcast %1 : vector<8x1xf32> to vector<8x256xf32>
    %8 = arith.addf %6, %7 : vector<8x256xf32>
    %cst_10 = arith.constant 0.000000e+00 : f32
    %9 = vector.broadcast %cst_10 : f32 to vector<8x256xf32>
    %10 = arith.maximumf %8, %9 : vector<8x256xf32>
    %cst_11 = arith.constant dense<0.000000e+00> : vector<32x256xf32>
    %11 = tpu.matmul %2, %10, %cst_11 {dimension_numbers = #tpu.dot_dimension_numbers<[1], [0], [0], [1], [0, 0, 1, 1], [], []>} : vector<32x8xf32>, vector<8x256xf32>, vector<32x256xf32> -> vector<32x256xf32>
    %12 = vector.broadcast %3 : vector<32x1xf32> to vector<32x256xf32>
    %13 = arith.addf %11, %12 : vector<32x256xf32>
    %14 = arith.addf %13, %5 : vector<32x256xf32>
    %c0_12 = arith.constant 0 : index
    %c0_13 = arith.constant 0 : index
    %c0_14 = arith.constant 0 : index
    %15 = vector.load %arg7[%c0_12, %c0_13, %c0_14] : memref<2x32x256xf32, #tpu.memory_space<vmem>>, vector<1x32x256xf32>
    %16 = vector.shape_cast %15 : vector<1x32x256xf32> to vector<32x256xf32>
    %17 = vector.shape_cast %14 : vector<32x256xf32> to vector<1x32x256xf32>
    tpu.vector_store %arg7[%c0_12, %c0_13, %c0_14], %17 {strides = array<i32>} : memref<2x32x256xf32, #tpu.memory_space<vmem>>, vector<1x32x256xf32>,
    %c1 = arith.constant 1 : index
    %c0_15 = arith.constant 0 : index
    %c0_16 = arith.constant 0 : index
    %18 = vector.load %arg2[%c1, %c0_15, %c0_16] : memref<2x32x256xf32, #tpu.memory_space<vmem>>, vector<1x32x256xf32>
    %19 = vector.shape_cast %18 : vector<1x32x256xf32> to vector<32x256xf32>
    %cst_17 = arith.constant dense<0.000000e+00> : vector<8x256xf32>
    %20 = tpu.matmul %0, %19, %cst_17 {dimension_numbers = #tpu.dot_dimension_numbers<[1], [0], [0], [1], [0, 0, 1, 1], [], []>} : vector<8x32xf32>, vector<32x256xf32>, vector<8x256xf32> -> vector<8x256xf32>
    %21 = vector.broadcast %1 : vector<8x1xf32> to vector<8x256xf32>
    %22 = arith.addf %20, %21 : vector<8x256xf32>
    %cst_18 = arith.constant 0.000000e+00 : f32
    %23 = vector.broadcast %cst_18 : f32 to vector<8x256xf32>
    %24 = arith.maximumf %22, %23 : vector<8x256xf32>
    %cst_19 = arith.constant dense<0.000000e+00> : vector<32x256xf32>
    %25 = tpu.matmul %2, %24, %cst_19 {dimension_numbers = #tpu.dot_dimension_numbers<[1], [0], [0], [1], [0, 0, 1, 1], [], []>} : vector<32x8xf32>, vector<8x256xf32>, vector<32x256xf32> -> vector<32x256xf32>
    %26 = vector.broadcast %3 : vector<32x1xf32> to vector<32x256xf32>
    %27 = arith.addf %25, %26 : vector<32x256xf32>
    %28 = arith.addf %27, %19 : vector<32x256xf32>
    %c1_20 = arith.constant 1 : index
    %c0_21 = arith.constant 0 : index
    %c0_22 = arith.constant 0 : index
    %29 = vector.load %arg7[%c1_20, %c0_21, %c0_22] : memref<2x32x256xf32, #tpu.memory_space<vmem>>, vector<1x32x256xf32>
    %30 = vector.shape_cast %29 : vector<1x32x256xf32> to vector<32x256xf32>
    %31 = vector.shape_cast %28 : vector<32x256xf32> to vector<1x32x256xf32>
    tpu.vector_store %arg7[%c1_20, %c0_21, %c0_22], %31 {strides = array<i32>} : memref<2x32x256xf32, #tpu.memory_space<vmem>>, vector<1x32x256xf32>,
    return
  }
  func.func @transform_0(%arg0: i32, %arg1: i32) -> (i32, i32, i32) {
    %c0_i32 = arith.constant 0 : i32
    %c0_i32_0 = arith.constant 0 : i32
    return %arg0, %c0_i32, %arg1 : i32, i32, i32
  }
  func.func @transform_1(%arg0: i32, %arg1: i32) -> (i32, i32) {
    %c0_i32 = arith.constant 0 : i32
    %c0_i32_0 = arith.constant 0 : i32
    %c0_i32_1 = arith.constant 0 : i32
    return %c0_i32, %c0_i32_0 : i32, i32
  }
  func.func @transform_2(%arg0: i32, %arg1: i32) -> (i32, i32) {
    %c0_i32 = arith.constant 0 : i32
    %c0_i32_0 = arith.constant 0 : i32
    %c0_i32_1 = arith.constant 0 : i32
    return %c0_i32, %c0_i32_0 : i32, i32
  }
  func.func @transform_3(%arg0: i32, %arg1: i32) -> (i32, i32) {
    %c0_i32 = arith.constant 0 : i32
    %c0_i32_0 = arith.constant 0 : i32
    %c0_i32_1 = arith.constant 0 : i32
    return %c0_i32, %c0_i32_0 : i32, i32
  }
  func.func @transform_4(%arg0: i32, %arg1: i32) -> (i32, i32) {
    %c0_i32 = arith.constant 0 : i32
    %c0_i32_0 = arith.constant 0 : i32
    %c0_i32_1 = arith.constant 0 : i32
    return %c0_i32, %c0_i32_0 : i32, i32
  }
  func.func @transform_5(%arg0: i32, %arg1: i32) -> (i32, i32, i32) {
    %c0_i32 = arith.constant 0 : i32
    %c0_i32_0 = arith.constant 0 : i32
    return %arg0, %c0_i32, %arg1 : i32, i32, i32
  }
}

</mosaic_0001>

<bundles_post_ra>
// kernel: tpu_custom_call.1
= control target key start
LH: loop header
LB: loop body
LE: loop exit
PB: predicated region body
PF: predicated region fallthrough
CT: control target
= control target key end

     0   :  { %10 = vsyncpa [#allocation3], 0  ;;  %s762_s0 = inlined_call_operand.hbm [shape: f32[2,32,256], index: 0, kind: input, shape index: {}]   ;;  %s763_s1 = inlined_call_operand.vmem [shape: f32[8,32], index: 1, kind: input, shape index: {}]   ;;  %s764_s2 = inlined_call_operand.vmem [shape: f32[8,1], index: 2, kind: input, shape index: {}]   ;;  %s765_s3 = inlined_call_operand.vmem [shape: f32[32,8], index: 3, kind: input, shape index: {}]   ;;  %s766_s4 = inlined_call_operand.vmem [shape: f32[32,1], index: 4, kind: input, shape index: {}]   ;;  %s767_s5 = inlined_call_operand.hbm [shape: f32[2,32,256], index: 5, kind: output, shape index: {}]  }
   0x1   :  { %11 = vsyncpa [#allocation4], 0  ;;  %s562_s18 = smov [#allocation2]   ;;  %s514_s22 = scalar_lea.hbm %s762_s0, 2048 }
   0x2   :  { %s17_s19 = sshll.u32 %s562_s18, 4  ;;  %p515_p0 = scmp.ne.s32.totalorder %s762_s0, %s514_s22  ;;  %s18_s19 = int_to_ptr.vmem [resolvable:$true] %s17_s19 }
   0x3   :  { %p518_p1 = scmp.lt.u32.totalorder %s514_s22, %s762_s0 }
   0x5   :  { %p520_p2 = pnand %p518_p1, %p515_p0 }
   0x7   :  { %523 = shalt.err (!%p520_p2)
}
   0x8   :  { %s524_s27 = scalar_lea.vmem %s18_s19, 2048  ;;  %p529_p4 = scmp.lt.s32.totalorder %s18_s19, %s18_s19 }
   0x9   :  { %p525_p3 = scmp.ne.s32.totalorder %s18_s19, %s524_s27  ;;  %p530_p5 = scmp.lt.s32.totalorder %s524_s27, %s524_s27 }
   0xb   :  { %p531_p6 = por %p530_p5, %p529_p4 }
   0xd   :  { %p532_p7 = pnand %p531_p6, %p525_p3 }
   0xf   :  { %535 = shalt.err (!%p532_p7)
}
  0x10   :  { %s563_s28 = smov 256   ;;  %s564_s29 = smov 16  }
  0x11   :  { %23 = dma.hbm_to_vmem [thread:$0]  %s762_s0, 2048, %s18_s19, [#allocation3], %s563_s28, %s563_s28, %s564_s29  }
  0x12   :  { %558 = dma.done.wait [#allocation3], 2048  }
  0x13   :  { %559 = vsyncadd [#allocation3], 4294965248  ;;  %v565_v0 = vmov 0.0   ;;  %v566_v1 = vmov 0   ;;  %v615_v2 = vld [vmem:[#allocation2 + $0x8] sm:$0xff]  ;;  %v617_v3 = vld [vmem:[#allocation2 + $0x18] sm:$0xff] }
  0x14   :  { %126 = vmatprep.mubr.f32.mxu0 %v565_v0  ;;  %512 = vset.pattern.permute.xlu0 %v566_v1  ;;  %v619_v4 = vld [vmem:[#allocation2] sm:$0xff]  ;;  %v488_v5 = vpack.c.bf16 %v617_v3, %v615_v2  ;;  %v623_v6 = vld [vmem:[#allocation2 + $0x10] sm:$0xff]  ;;  %v625_v7 = vld [vmem:[#allocation2 + $0x28] sm:$0xff]  ;;  %vm58_vm0 = vcmask 261120   ;;  %vm155_vm1 = vcmask 64512  }
  0x15   :  { %244 = vmatprep.mubr.f32.mxu1 %v565_v0  ;;  %513 = vset.pattern.permute.xlu1 %v566_v1  ;;  %v627_v8 = vld [vmem:[#allocation2 + $0x38] sm:$0xff]  ;;  %v490_v9 = vpack.c.bf16 %v623_v6, %v619_v4  ;;  %v633_v11 = vld [vmem:[#allocation2 + $0x20] sm:$0xff]  ;;  %v635_v12 = vld [vmem:[#allocation2 + $0x30] sm:$0xff] }
  0x16   :  { %v492_v10 = vpack.c.bf16 %v627_v8, %v625_v7  ;;  %489 = vmatprep.subr.bf16.mxu0 %v488_v5  ;;  %v36_v13 = vld [vmem:[%s764_s2] sm:$0xff]  ;;  %v494_v14 = vpack.c.bf16 %v635_v12, %v633_v11  ;;  %v44_v17 = vld [vmem:[%s766_s4 + $0x18] sm:$0xff]  ;;  %v42_v18 = vld [vmem:[%s766_s4 + $0x8] sm:$0xff] }
  0x17   :  { %491 = vmatpush1.bf16.msra.mxu0 %v490_v9  ;;  %55 = vperm.xlu0 %512, %v36_v13   ;;  %v41_v15 = vld [vmem:[%s766_s4] sm:$0xff]  ;;  %v660_v24 = vld [vmem:[#allocation2 + $0x48] sm:$0xff]  ;;  %v662_v25 = vld [vmem:[#allocation2 + $0x58] sm:$0xff] }
  0x18   :  { %493 = vmatprep.subr.bf16.mxu0 %v492_v10  ;;  %v35_v16 = vld [vmem:[%s763_s1] sm:$0xff]  ;;  %142 = vperm.xlu1 %513, %v42_v18   ;;  %v666_v27 = vld [vmem:[#allocation2 + $0x50] sm:$0xff]  ;;  %v668_v29 = vld [vmem:[#allocation2 + $0x68] sm:$0xff]  ;;  %v496_v34 = vpack.c.bf16 %v662_v25, %v660_v24 }
  0x19   :  { %v664_v26 = vld [vmem:[#allocation2 + $0x40] sm:$0xff]  ;;  %v670_v30 = vld [vmem:[#allocation2 + $0x78] sm:$0xff]  ;;  %v680_v33 = vld [vmem:[%s765_s3 + $0x10] sm:$0xff] }
  0x1a   :  { %v675_v32 = vld [vmem:[%s765_s3] sm:$0xff]  ;;  %v498_v35 = vpack.c.bf16 %v666_v27, %v664_v26  ;;  %v500_v36 = vpack.c.bf16 %v670_v30, %v668_v29  ;;  %v690_v38 = vld [vmem:[#allocation2 + $0x70] sm:$0xff]  ;;  %v38_v39 = vld [vmem:[%s765_s3 + $0x8] sm:$0xff] }
  0x1b   :  { %495 = vmatpush1.bf16.msra.mxu0 %v494_v14  ;;  %137 = vperm.xlu0 %512, %v41_v15   ;;  %v688_v37 = vld [vmem:[#allocation2 + $0x60] sm:$0xff]  ;;  %v40_v40 = vld [vmem:[%s765_s3 + $0x18] sm:$0xff]  ;;  %v43_v42 = vld [vmem:[%s766_s4 + $0x10] sm:$0xff]  ;;  %s567_s4 = smov [#allocation5]  }
  0x1c   :  { %v502_v41 = vpack.c.bf16 %v690_v38, %v688_v37  ;;  %147 = vperm.xlu1 %513, %v43_v42   ;;  %s466_s23 = sshll.u32 %s567_s4, 4  ;;  %s467_s23 = int_to_ptr.vmem [resolvable:$true] %s466_s23 }
  0x1d   :  { %s536_s24 = scalar_lea.vmem %s467_s23, 2048  ;;  %p541_p9 = scmp.lt.s32.totalorder %s467_s23, %s467_s23 }
  0x1e   :  { %478 = vmatmul.mubr.msk.f32.vlgmr.msra.gmra.mrb[0].mxu0 %vm58_vm0, %v35_v16  ;;  %p537_p8 = scmp.ne.s32.totalorder %s467_s23, %s536_s24  ;;  %p542_p10 = scmp.lt.s32.totalorder %s536_s24, %s536_s24 }
  0x1f   :  { %152 = vperm.xlu0 %512, %v44_v17   ;;  %232 = vmatprep.mubr.f32.mxu0 %v565_v0 }
  0x20   :  { %p543_p11 = por %p542_p10, %p541_p9 }
  0x22   :  { %p544_p12 = pnand %p543_p11, %p537_p8 }
  0x96   :  { %v656_v19 = vpop.permute.xlu0 %55 }
  0x97   :  { %v143_v50 = vpop.permute.xlu1 %142 }
  0x9a   :  { %v138_v43 = vpop.permute.xlu0 %137 }
  0x9e   :  { %v714_v51 = vpop.permute.xlu0 %152 }
  0xf1   :  { %v128_v20 = vpop.f32.mrb[0].mxu0 }
  0xf2   :  { %v129_v21 = vadd.f32 %v128_v20, %v656_v19  ;;  %v130_v22 = vpop.f32.mrb[1].mxu0 }
  0xf3   :  { %v131_v23 = vadd.f32 %v130_v22, %v656_v19 }
  0xf4   :  { %v133_v31 = vmax.f32 %v129_v21, 0.0 }
  0xf5   :  { %v134_v28 = vmax.f32 %v131_v23, 0.0 }
  0xf7   :  { %168 = vmatprep.subr.mxu0 %v134_v28  ;;  %504 = vmatprep.subr.mxu1 %v134_v28 }
  0xf8   :  { %169 = vmatpush1.msra.mxu0 %v133_v31  ;;  %505 = vmatpush1.msra.mxu1 %v133_v31 }
  0xf9   :  { %479 = vmatmul.mubr.msk.f32.vlgmr.msra.gmra.mrb[2].mxu0 %vm155_vm1, %v675_v32  ;;  %481 = vmatmul.mubr.msk.f32.vlgmr.msra.gmra.mrb[0].mxu1 %vm155_vm1, %v680_v33 }
  0xfa   :  { %497 = vmatprep.subr.bf16.mxu0 %v496_v34  ;;  %238 = vmatprep.mubr.f32.mxu0 %v565_v0 }
  0xfb   :  { %499 = vmatpush1.bf16.msra.mxu0 %v498_v35  ;;  %250 = vmatprep.mubr.f32.mxu1 %v565_v0 }
  0xfc   :  { %501 = vmatprep.subr.bf16.mxu0 %v500_v36 }
  0xfd   :  { %480 = vmatmul.mubr.msk.f32.gmra.mrb[4].mxu0 %vm155_vm1, %v38_v39  ;;  %482 = vmatmul.mubr.msk.f32.gmra.mrb[2].mxu1 %vm155_vm1, %v40_v40 }
  0xfe   :  { %346 = vmatprep.mubr.f32.mxu0 %v565_v0  ;;  %419 = vmatprep.mubr.f32.mxu1 %v565_v0 }
  0xff   :  { %503 = vmatpush1.bf16.msra.mxu0 %v502_v41 }
 0x102   :  { %483 = vmatmul.mubr.msk.f32.vlgmr.msra.gmra.mrb[6].mxu0 %vm58_vm0, %v35_v16 }
 0x1cc   :  { %v234_v44 = vpop.f32.mrb[2].mxu0  ;;  %v246_v45 = vpop.f32.mrb[0].mxu1 }
 0x1cd   :  { %v235_v46 = vadd.f32 %v234_v44, %v138_v43  ;;  %v236_v47 = vpop.f32.mrb[3].mxu0  ;;  %v248_v48 = vpop.f32.mrb[1].mxu1 }
 0x1ce   :  { %v237_v49 = vadd.f32 %v236_v47, %v138_v43 }
 0x1cf   :  { %v257_v52 = vadd.f32 %v235_v46, %v619_v4 }
 0x1d0   :  { %v258_v53 = vadd.f32 %v237_v49, %v615_v2  ;;  %v240_v54 = vpop.f32.mrb[4].mxu0  ;;  %v252_v55 = vpop.f32.mrb[2].mxu1 }
 0x1d1   :  { %265 = vst [vmem:[#allocation5] sm:$0xff] %v257_v52  ;;  %v241_v56 = vadd.f32 %v240_v54, %v143_v50  ;;  %v253_v57 = vadd.f32 %v252_v55, %v714_v51  ;;  %v242_v58 = vpop.f32.mrb[5].mxu0  ;;  %v254_v59 = vpop.f32.mrb[3].mxu1 }
 0x1d2   :  { %266 = vst [vmem:[#allocation5 + $0x8] sm:$0xff] %v258_v53  ;;  %v243_v60 = vadd.f32 %v242_v58, %v143_v50  ;;  %v255_v61 = vadd.f32 %v254_v59, %v714_v51 }
 0x1d3   :  { %v259_v62 = vadd.f32 %v241_v56, %v623_v6  ;;  %v263_v63 = vadd.f32 %v253_v57, %v635_v12 }
 0x1d4   :  { %v260_v1 = vadd.f32 %v243_v60, %v617_v3  ;;  %v264_v2 = vadd.f32 %v255_v61, %v627_v8  ;;  %v148_v3 = vpop.permute.xlu1 %147 }
 0x1d5   :  { %267 = vst [vmem:[#allocation5 + $0x10] sm:$0xff] %v259_v62  ;;  %271 = vst [vmem:[#allocation5 + $0x30] sm:$0xff] %v263_v63  ;;  %v348_v4 = vpop.f32.mrb[6].mxu0  ;;  %v247_v6 = vadd.f32 %v246_v45, %v148_v3  ;;  %v249_v8 = vadd.f32 %v248_v48, %v148_v3 }
 0x1d6   :  { %268 = vst [vmem:[#allocation5 + $0x18] sm:$0xff] %v260_v1  ;;  %272 = vst [vmem:[#allocation5 + $0x38] sm:$0xff] %v264_v2  ;;  %v349_v5 = vadd.f32 %v348_v4, %v656_v19  ;;  %v350_v9 = vpop.f32.mrb[7].mxu0 }
 0x1d7   :  { %v351_v10 = vadd.f32 %v350_v9, %v656_v19  ;;  %v261_v12 = vadd.f32 %v247_v6, %v633_v11  ;;  %v262_v15 = vadd.f32 %v249_v8, %v625_v7 }
 0x1d8   :  { %v353_v14 = vmax.f32 %v349_v5, 0.0 }
 0x1d9   :  { %v354_v13 = vmax.f32 %v351_v10, 0.0  ;;  %269 = vst [vmem:[#allocation5 + $0x20] sm:$0xff] %v261_v12  ;;  %270 = vst [vmem:[#allocation5 + $0x28] sm:$0xff] %v262_v15 }
 0x1db   :  { %355 = vmatprep.subr.mxu1 %v354_v13 }
 0x1dc   :  { %356 = vmatpush1.msra.mxu1 %v353_v14 }
 0x1dd   :  { %484 = vmatmul.mubr.msk.f32.vlgmr.msra.gmra.mrb[4].mxu1 %vm155_vm1, %v675_v32 }
 0x1de   :  { %425 = vmatprep.mubr.f32.mxu1 %v565_v0 }
 0x1e1   :  { %485 = vmatmul.mubr.msk.f32.gmra.mrb[6].mxu1 %vm155_vm1, %v38_v39 }
 0x1e2   :  { %431 = vmatprep.mubr.f32.mxu1 %v565_v0 }
 0x1e5   :  { %486 = vmatmul.mubr.msk.f32.gmra.mrb[8].mxu1 %vm155_vm1, %v680_v33 }
 0x1e6   :  { %437 = vmatprep.mubr.f32.mxu1 %v565_v0 }
 0x1e9   :  { %487 = vmatmul.mubr.msk.f32.gmra.mrb[10].mxu1 %vm155_vm1, %v40_v40 }
 0x2b0   :  { %v421_v16 = vpop.f32.mrb[4].mxu1 }
 0x2b1   :  { %v422_v17 = vadd.f32 %v421_v16, %v138_v43  ;;  %v423_v18 = vpop.f32.mrb[5].mxu1 }
 0x2b2   :  { %v424_v19 = vadd.f32 %v423_v18, %v138_v43 }
 0x2b3   :  { %v444_v20 = vadd.f32 %v422_v17, %v664_v26 }
 0x2b4   :  { %v445_v21 = vadd.f32 %v424_v19, %v660_v24  ;;  %v427_v0 = vpop.f32.mrb[6].mxu1 }
 0x2b5   :  { %453 = vst [vmem:[#allocation5 + $0x40] sm:$0xff] %v444_v20  ;;  %v428_v22 = vadd.f32 %v427_v0, %v143_v50  ;;  %v429_v23 = vpop.f32.mrb[7].mxu1 }
 0x2b6   :  { %454 = vst [vmem:[#allocation5 + $0x48] sm:$0xff] %v445_v21  ;;  %v430_v28 = vadd.f32 %v429_v23, %v143_v50 }
 0x2b7   :  { %v446_v11 = vadd.f32 %v428_v22, %v666_v27 }
 0x2b8   :  { %v447_v7 = vadd.f32 %v430_v28, %v662_v25  ;;  %v433_v31 = vpop.f32.mrb[8].mxu1 }
 0x2b9   :  { %455 = vst [vmem:[#allocation5 + $0x50] sm:$0xff] %v446_v11  ;;  %v434_v32 = vadd.f32 %v433_v31, %v148_v3  ;;  %v435_v33 = vpop.f32.mrb[9].mxu1 }
 0x2ba   :  { %456 = vst [vmem:[#allocation5 + $0x58] sm:$0xff] %v447_v7  ;;  %v436_v34 = vadd.f32 %v435_v33, %v148_v3 }
 0x2bb   :  { %v448_v26 = vadd.f32 %v434_v32, %v688_v37 }
 0x2bc   :  { %v449_v24 = vadd.f32 %v436_v34, %v668_v29  ;;  %v439_v35 = vpop.f32.mrb[10].mxu1 }
 0x2bd   :  { %457 = vst [vmem:[#allocation5 + $0x60] sm:$0xff] %v448_v26  ;;  %v440_v36 = vadd.f32 %v439_v35, %v714_v51  ;;  %v441_v39 = vpop.f32.mrb[11].mxu1 }
 0x2be   :  { %458 = vst [vmem:[#allocation5 + $0x68] sm:$0xff] %v449_v24  ;;  %v442_v25 = vadd.f32 %v441_v39, %v714_v51 }
 0x2bf   :  { %v450_v27 = vadd.f32 %v440_v36, %v690_v38 }
 0x2c0   :  { %v451_v40 = vadd.f32 %v442_v25, %v670_v30 }
 0x2c1   :  { %459 = vst [vmem:[#allocation5 + $0x70] sm:$0xff] %v450_v27 }
 0x2c2   :  { %460 = vst [vmem:[#allocation5 + $0x78] sm:$0xff] %v451_v40 }
 0x2c3   :  { %547 = shalt.err (!%p544_p12)
}
 0x2c4   :  { %s548_s27 = scalar_lea.hbm %s767_s5, 2048 }
 0x2c5   :  { %p549_p13 = scmp.ne.s32.totalorder %s767_s5, %s548_s27  ;;  %p552_p0 = scmp.lt.u32.totalorder %s548_s27, %s767_s5 }
 0x2c7   :  { %p554_p1 = pnand %p552_p0, %p549_p13 }
 0x2c9   :  { %557 = shalt.err (!%p554_p1)
}
 0x2ca   :  { %472 = dma.vmem_to_hbm [thread:$0]  %s467_s23, 2048, %s767_s5, [#allocation4], %s563_s28, %s563_s28, %s564_s29  }
 0x2cb   :  { %560 = dma.done.wait [#allocation4], 2048  }
 0x2cc   :  { %561 = vsyncadd [#allocation4], 4294965248 }
 0x2cd   :  { %476 = vsyncpa [#allocation3], 1 }
 0x2ce   :  { %477 = vsyncpa [#allocation4], 1 }

</bundles_post_ra>
